<compile_context>
chip_gen: v7x
topology: tpu7x:2x2x1
jax: 0.10.0
libtpu: 0.0.40
codegen_flags: <defaults>
</compile_context>

<pallas_src>
import jax
import jax.numpy as jnp
from jax.experimental import pallas as pl
from jax.experimental.pallas import tpu as pltpu

_CHUNK_F32_BYTES = 512 * 1024  # live f32 product per multiply/reduce step


def cfconv_kernel(s_ref, ef_ref, o_ref, acc_ref):
    # s_ref:   (TJ, H)      node features for the current j tile
    # ef_ref:  (TI, TJ, H)  edge-mask tile (dominates HBM traffic)
    # o_ref:   (TI, H)      output block (resident across the j grid axis)
    # acc_ref: (TI, H) f32  VMEM accumulator carried across j steps
    j = pl.program_id(2)

    @pl.when(j == 0)
    def _init():
        acc_ref[...] = jnp.zeros_like(acc_ref)

    ti, tj, h = ef_ref.shape
    # Sub-chunk the j tile so each multiply/reduce keeps only a small f32
    # product live instead of materializing the full (TI, TJ, H) intermediate.
    jc = max(1, min(tj, _CHUNK_F32_BYTES // max(1, ti * h * 4)))
    while tj % jc:
        jc -= 1

    acc = acc_ref[...]
    for c in range(tj // jc):  # static trip count -> unrolled at trace time
        ef_c = ef_ref[:, pl.ds(c * jc, jc), :].astype(jnp.float32)  # (TI, jc, H)
        s_c = s_ref[pl.ds(c * jc, jc), :].astype(jnp.float32)       # (jc, H)
        # elementwise multiply (VPU) + sublane reduce over jc (XLU)
        acc = acc + jnp.sum(ef_c * s_c[None, :, :], axis=1)         # (TI, H)
    acc_ref[...] = acc

    @pl.when(j == pl.num_programs(2) - 1)
    def _finalize():
        o_ref[...] = acc_ref[...].astype(o_ref.dtype)


def _tile_candidates(n):
    """Divisors of n that are multiples of 8, plus the full extent n.

    Both are always legal sizes for the last-two-dims (8, 128) block rule
    (second-last dim divisible by 8, or equal to the full array dim)."""
    cands = sorted(d for d in range(8, n + 1, 8) if n % d == 0)
    if n not in cands:
        cands.append(n)
    return cands


def cfconv(s, mask, *, ef_tile_bytes=4 * 1024 * 1024):
    """out[b, i, h] = sum_j mask[b, i, j, h] * s[b, j, h]."""
    B, N, H = s.shape
    assert mask.shape == (B, N, N, H), (s.shape, mask.shape)
    out_dtype = jnp.result_type(s.dtype, mask.dtype)
    ef_item = jnp.dtype(mask.dtype).itemsize

    cands = _tile_candidates(N)

    def _largest_leq(cap):
        ok = [d for d in cands if d <= cap]
        return ok[-1] if ok else cands[0]

    def _shrink(d):
        smaller = [c for c in cands if c < d]
        return smaller[-1] if smaller else d

    ti = _largest_leq(128)
    tj = _largest_leq(128)
    # Shrink tiles (staying on legal divisors of N) until one mask tile fits
    # the per-pipeline-buffer byte budget.
    while ti * tj * H * ef_item > ef_tile_bytes:
        new_tj, new_ti = _shrink(tj), _shrink(ti)
        if new_tj < tj:
            tj = new_tj
        elif new_ti < ti:
            ti = new_ti
        else:
            break

    grid = (B, N // ti, N // tj)  # reduction axis (j) last

    return pl.pallas_call(
        cfconv_kernel,
        out_shape=jax.ShapeDtypeStruct((B, N, H), out_dtype),
        grid_spec=pltpu.PrefetchScalarGridSpec(
            num_scalar_prefetch=0,
            grid=grid,
            in_specs=[
                # node features: only the current j tile is needed
                pl.BlockSpec((None, tj, H), lambda b, i, j: (b, j, 0)),
                # edge mask: streamed (TI, TJ, H) tiles, the HBM-traffic hog
                pl.BlockSpec((None, ti, tj, H), lambda b, i, j: (b, i, j, 0)),
            ],
            # same block across j -> output stays resident, written at j==last
            out_specs=pl.BlockSpec((None, ti, H), lambda b, i, j: (b, i, 0)),
            scratch_shapes=[pltpu.VMEM((ti, H), jnp.float32)],
        ),
        compiler_params=pltpu.CompilerParams(
            dimension_semantics=("parallel", "parallel", "arbitrary"),
            # safe on all generations (v7x scoped default); raise alongside
            # ef_tile_bytes on v5e/v6e (128 MiB physical) for larger tiles
            vmem_limit_bytes=32 * 1024 * 1024,
        ),
    )(s, mask)


def reference(s, mask):
    return jnp.sum(mask * s[:, None, :, :], axis=2)


if __name__ == "__main__":
    # batch=2, atoms=8, hidden=32 (small shapes consistent with the module)
    B, N, H = 2, 8, 32
    key = jax.random.PRNGKey(0)
    k0, k1 = jax.random.split(key)
    s = jax.random.normal(k0, (B, N, H), jnp.float32)
    mask = jax.random.normal(k1, (B, N, N, H), jnp.float32)

    out = jax.block_until_ready(cfconv(s, mask))
    ref = jax.block_until_ready(reference(s, mask))
    assert out.shape == (B, N, H)
    err = float(jnp.max(jnp.abs(out - ref)))
    assert jnp.allclose(out, ref, atol=1e-4, rtol=1e-4), err
    print("KERNEL_OK")
</pallas_src>

<mosaic_0001>
module attributes {stable_mosaic.version = 11 : i64} {
  func.func @cfconv_kernel(%arg0: i32, %arg1: i32, %arg2: i32, %arg3: memref<1x8x32xf32, #tpu.memory_space<vmem>>, %arg4: memref<1x8x8x32xf32, #tpu.memory_space<vmem>>, %arg5: memref<1x8x32xf32, #tpu.memory_space<vmem>>, %arg6: memref<8x32xf32, #tpu.memory_space<vmem>>) attributes {dimension_semantics = [#tpu.dimension_semantics<parallel>, #tpu.dimension_semantics<parallel>, #tpu.dimension_semantics<arbitrary>], iteration_bounds = array<i64: 2, 1, 1>, scalar_prefetch = 0 : i64, scratch_operands = 1 : i64, tpu.core_type = #tpu.core_type<tc>, window_params = [{transform_indices = @transform_0, window_bounds = array<i64: 1, 8, 32>}, {transform_indices = @transform_1, window_bounds = array<i64: 1, 8, 8, 32>}, {transform_indices = @transform_2, window_bounds = array<i64: 1, 8, 32>}]} {
    %c0_i32 = arith.constant 0 : i32
    %0 = arith.cmpi eq, %arg2, %c0_i32 : i32
    %1 = arith.extui %0 : i1 to i32
    %c0_i32_0 = arith.constant 0 : i32
    %2 = arith.cmpi ne, %1, %c0_i32_0 : i32
    scf.if %2 {
      %cst_13 = arith.constant 0.000000e+00 : f32
      %17 = vector.broadcast %cst_13 : f32 to vector<8x32xf32>
      %c0_14 = arith.constant 0 : index
      %c0_15 = arith.constant 0 : index
      %18 = vector.load %arg6[%c0_14, %c0_15] : memref<8x32xf32, #tpu.memory_space<vmem>>, vector<8x32xf32>
      tpu.vector_store %arg6[%c0_14, %c0_15], %17 {strides = array<i32>} : memref<8x32xf32, #tpu.memory_space<vmem>>, vector<8x32xf32>,
    } else {
    }
    %c0 = arith.constant 0 : index
    %c0_1 = arith.constant 0 : index
    %3 = vector.load %arg6[%c0, %c0_1] : memref<8x32xf32, #tpu.memory_space<vmem>>, vector<8x32xf32>
    %c0_2 = arith.constant 0 : index
    %c0_3 = arith.constant 0 : index
    %c0_4 = arith.constant 0 : index
    %c0_5 = arith.constant 0 : index
    %4 = vector.load %arg4[%c0_2, %c0_3, %c0_4, %c0_5] : memref<1x8x8x32xf32, #tpu.memory_space<vmem>>, vector<1x8x8x32xf32>
    %5 = vector.shape_cast %4 : vector<1x8x8x32xf32> to vector<8x8x32xf32>
    %c0_6 = arith.constant 0 : index
    %c0_7 = arith.constant 0 : index
    %c0_8 = arith.constant 0 : index
    %6 = vector.load %arg3[%c0_6, %c0_7, %c0_8] : memref<1x8x32xf32, #tpu.memory_space<vmem>>, vector<1x8x32xf32>
    %7 = vector.shape_cast %6 : vector<1x8x32xf32> to vector<8x32xf32>
    %8 = vector.shape_cast %7 : vector<8x32xf32> to vector<1x8x32xf32>
    %9 = vector.broadcast %8 : vector<1x8x32xf32> to vector<8x8x32xf32>
    %10 = arith.mulf %5, %9 : vector<8x8x32xf32>
    %cst = arith.constant dense<0.000000e+00> : vector<8x32xf32>
    %11 = vector.multi_reduction <add>, %10, %cst [1] : vector<8x8x32xf32> to vector<8x32xf32>
    %12 = arith.addf %3, %11 : vector<8x32xf32>
    %c0_9 = arith.constant 0 : index
    %c0_10 = arith.constant 0 : index
    %13 = vector.load %arg6[%c0_9, %c0_10] : memref<8x32xf32, #tpu.memory_space<vmem>>, vector<8x32xf32>
    tpu.vector_store %arg6[%c0_9, %c0_10], %12 {strides = array<i32>} : memref<8x32xf32, #tpu.memory_space<vmem>>, vector<8x32xf32>,
    %c0_i32_11 = arith.constant 0 : i32
    %14 = arith.cmpi eq, %arg2, %c0_i32_11 : i32
    %15 = arith.extui %14 : i1 to i32
    %c0_i32_12 = arith.constant 0 : i32
    %16 = arith.cmpi ne, %15, %c0_i32_12 : i32
    scf.if %16 {
      %c0_13 = arith.constant 0 : index
      %c0_14 = arith.constant 0 : index
      %17 = vector.load %arg6[%c0_13, %c0_14] : memref<8x32xf32, #tpu.memory_space<vmem>>, vector<8x32xf32>
      %c0_15 = arith.constant 0 : index
      %c0_16 = arith.constant 0 : index
      %c0_17 = arith.constant 0 : index
      %18 = vector.load %arg5[%c0_15, %c0_16, %c0_17] : memref<1x8x32xf32, #tpu.memory_space<vmem>>, vector<1x8x32xf32>
      %19 = vector.shape_cast %18 : vector<1x8x32xf32> to vector<8x32xf32>
      %20 = vector.shape_cast %17 : vector<8x32xf32> to vector<1x8x32xf32>
      tpu.vector_store %arg5[%c0_15, %c0_16, %c0_17], %20 {strides = array<i32>} : memref<1x8x32xf32, #tpu.memory_space<vmem>>, vector<1x8x32xf32>,
    } else {
    }
    return
  }
  func.func @transform_0(%arg0: i32, %arg1: i32, %arg2: i32) -> (i32, i32, i32) {
    %c0_i32 = arith.constant 0 : i32
    %c0_i32_0 = arith.constant 0 : i32
    return %arg0, %arg2, %c0_i32 : i32, i32, i32
  }
  func.func @transform_1(%arg0: i32, %arg1: i32, %arg2: i32) -> (i32, i32, i32, i32) {
    %c0_i32 = arith.constant 0 : i32
    %c0_i32_0 = arith.constant 0 : i32
    return %arg0, %arg1, %arg2, %c0_i32 : i32, i32, i32, i32
  }
  func.func @transform_2(%arg0: i32, %arg1: i32, %arg2: i32) -> (i32, i32, i32) {
    %c0_i32 = arith.constant 0 : i32
    %c0_i32_0 = arith.constant 0 : i32
    return %arg0, %arg1, %c0_i32 : i32, i32, i32
  }
}

</mosaic_0001>

<bundles_post_ra>
// kernel: tpu_custom_call.1
= control target key start
LH: loop header
LB: loop body
LE: loop exit
PB: predicated region body
PF: predicated region fallthrough
CT: control target
= control target key end

     0   :  { %7 = vsyncpa [#allocation4], 0  ;;  %s964_s0 = inlined_call_operand.hbm [shape: f32[2,8,32], index: 0, kind: input, shape index: {}]   ;;  %s965_s1 = inlined_call_operand.hbm [shape: f32[2,8,8,32], index: 1, kind: input, shape index: {}]   ;;  %s966_s2 = inlined_call_operand.hbm [shape: f32[2,8,32], index: 2, kind: output, shape index: {}]  }
   0x1   :  { %9 = vsyncpa [#allocation4 + $0x1], 0 }
   0x2   :  { %10 = vsyncpa [#allocation7], 0 }
   0x3   :  { %12 = vsyncpa [#allocation7 + $0x1], 0 }
   0x4   :  { %13 = vsyncpa [#allocation5], 0 }
   0x5   :  { %15 = vsyncpa [#allocation5 + $0x1], 0  ;;  %s724_s9 = smov 0   ;;  %s726_s10 = smov 0  }
   0x6   :  { %s728_s11 = smov 0   ;;  %s730_s12 = smov 0  }
   0x7   :  { %s732_s13 = smov 0   ;;  %s734_s14 = smov 0  }
   0x8 LB: > { %s467_s15 = sadd.s32 4294967295, %s701_s14   ;;  %s468_s16 = sadd.s32 4294967294, %s701_s14   ;;  %s701_s14 = sphi %s734_s14, %s21_s14   ;;  %s697_s13 = sphi %s732_s13, %s985_s13   ;;  %s693_s12 = sphi %s730_s12, %s984_s12   ;;  %s689_s11 = sphi %s728_s11, %s983_s11   ;;  %s685_s10 = sphi %s726_s10, %s982_s10   ;;  %s681_s9 = sphi %s724_s9, %s981_s9  }
   0x9   : > { %s40_s17 = sadd.s32 1, %s697_s13  ;;  %s49_s18 = sadd.s32 1, %s689_s11 }
   0xa   : > { %p42_p0 = scmp.ge.s32.totalorder %s40_s17, 2  ;;  %p56_p1 = scmp.ne.s32.totalorder %s689_s11, %s685_s10 }
   0xb   : > { %p57_p2 = scmp.eq.s32.totalorder %s701_s14, 0  ;;  %p62_p3 = scmp.ne.s32.totalorder %s685_s10, %s681_s9 }
   0xc   : > { %s987_s17 = smov (%p42_p0, %s40_s17), 0  ;;  %p63_p5 = scmp.eq.s32.totalorder %s467_s15, 0 }
   0xd   : > { %p765_p4 = por %p57_p2, %p56_p1  ;;  %s44_s20 = ssub.s32 %s697_s13, %s987_s17 }
   0xe   : > { %p118_p6 = scmp.eq.s32.totalorder %s467_s15, 1  ;;  %p47_p7 = scmp.eq.s32.totalorder %s44_s20, 0 }
   0xf   : > { %p771_p8 = por %p63_p5, %p62_p3  ;;  %p124_p10 = scmp.eq.s32.totalorder %s468_s16, 1 }
  0x10   : > { %p775_p9 = por %p118_p6, %p56_p1  ;;  %p502_p13 = scmp.lt.s32.totalorder %s701_s14, 2 }
  0x11   : > { %s970_s21 = scalar_select %p771_p8, 1, 0 }
  0x12   : > { %s971_s22 = scalar_select %p775_p9, 1, 0 }
  0x13   : > { %s780_s23 = scalar_select %p47_p7, %s689_s11, %s49_s18  }
  0x14   : > { %p782_p11 = por %p124_p10, %p62_p3  ;;  %s789_s25 = sand.u32 1, %s689_s11  }
  0x15   : > { %s471_s26 = sshll.u32 %s789_s25, 3  ;;  %s472_s27 = sshll.u32 %s697_s13, 7 }
  0x16   : > { %s972_s24 = scalar_select %p782_p11, 1, 0 }
  0x17   : > { %s796_s30 = scalar_lea.hbm %s964_s0, %s472_s27  ;;  %s148_s3 = scalar_lea.vmem [#allocation3], %s471_s26 }
  0x18   : > { %s156_s4 = sshll.u32 %s148_s3, 4  ;;  %p802_p0 = pnand %p502_p13, %p765_p4  ;;  %s798_s4 = int_to_ptr.vmem [resolvable:$true] %s156_s4 }
  0x19   : > { %s145_s6 = scalar_lea.sflag [#allocation4], %s789_s25  ;;  %s555_s7 = scalar_lea.hbm %s796_s30, 128 }
  0x1a   : > { %p556_p3 = scmp.ne.s32.totalorder %s796_s30, %s555_s7  ;;  %p557_p5 = pneg %p802_p0 }
  0x1b   : > { %s560_s16 = scalar_lea.hbm %s964_s0, 256  ;;  %p561_p4 = scmp.lt.u32.totalorder %s796_s30, %s964_s0 }
  0x1c   : > { %p558_p6 = pnand %p557_p5, %p556_p3  ;;  %p562_p10 = scmp.lt.u32.totalorder %s560_s16, %s555_s7 }
  0x1d   : > { %p564_p12 = scmp.lt.u32.totalorder %s555_s7, %s796_s30 }
  0x1e   : > { %p559_p7 = pneg %p558_p6  ;;  %p563_p13 = por %p562_p10, %p561_p4 }
  0x20   : > { %p565_p1 = por %p564_p12, %p563_p13 }
  0x22   : > { %p566_p2 = pnand %p565_p1, %p559_p7 }
  0x24   : > { %569 = shalt.err (!%p566_p2)
}
  0x25   : > { %s570_s20 = scalar_lea.vmem %s798_s4, 128  ;;  %s703_s26 = smov [#allocation3]  }
  0x26   : > { %p571_p3 = scmp.ne.s32.totalorder %s798_s4, %s570_s20  ;;  %s575_s27 = sshll.u32 %s703_s26, 4  ;;  %s576_s27 = int_to_ptr.vmem [resolvable:$false] %s575_s27 }
  0x27   : > { %s577_s28 = scalar_lea.vmem %s576_s27, 256  ;;  %p578_p9 = scmp.lt.s32.totalorder %s798_s4, %s576_s27 }
  0x28   : > { %p573_p6 = pnand %p571_p3, %p557_p5  ;;  %p579_p4 = scmp.lt.s32.totalorder %s577_s28, %s570_s20 }
  0x2a   : > { %p574_p11 = pneg %p573_p6  ;;  %p580_p10 = por %p579_p4, %p578_p9 }
  0x2c   : > { %p581_p12 = pnand %p580_p10, %p574_p11 }
  0x2e   : > { %584 = shalt.err (!%p581_p12)
}
  0x2f   : > { %494 = dma.hbm_to_vmem [thread:$0]  (!%p802_p0), %s796_s30, 128, %s798_s4, %s145_s6  }
  0x30   : > { %p974_p1 = scmp.lt.s32.totalorder %s701_s14, 3  ;;  %p975_p2 = scmp.ge.s32.totalorder %s701_s14, 1 }
  0x31   : > { %s473_s3 = sshll.u32 %s789_s25, 6  ;;  %s484_s7 = sshll.u32 %s697_s13, 10 }
  0x32   : > { %p838_p7 = pnand %p975_p2, %p974_p1  ;;  %s847_s16 = scalar_lea.hbm %s965_s1, %s484_s7 }
  0x33   : > { %s167_s18 = scalar_lea.vmem [#allocation6], %s473_s3  ;;  %s164_s30 = scalar_lea.sflag [#allocation7], %s789_s25 }
  0x34   : > { %s177_s19 = sshll.u32 %s167_s18, 4  ;;  %s585_s4 = scalar_lea.hbm %s847_s16, 1024  ;;  %s849_s19 = int_to_ptr.vmem [resolvable:$true] %s177_s19 }
  0x35   : > { %p586_p9 = scmp.ne.s32.totalorder %s847_s16, %s585_s4  ;;  %s590_s26 = scalar_lea.hbm %s965_s1, 2048 }
  0x36   : > { %p591_p3 = scmp.lt.u32.totalorder %s847_s16, %s965_s1  ;;  %p592_p6 = scmp.lt.u32.totalorder %s590_s26, %s585_s4 }
  0x37   : > { %p588_p11 = pnand %p586_p9, %p557_p5  ;;  %p594_p10 = scmp.lt.u32.totalorder %s585_s4, %s847_s16 }
  0x38   : > { %p593_p4 = por %p592_p6, %p591_p3 }
  0x39   : > { %p589_p13 = pneg %p588_p11 }
  0x3a   : > { %p595_p12 = por %p594_p10, %p593_p4 }
  0x3c   : > { %p596_p1 = pnand %p595_p12, %p589_p13 }
  0x3e   : > { %599 = shalt.err (!%p596_p1)
}
  0x3f   : > { %s600_s3 = scalar_lea.vmem %s849_s19, 1024  ;;  %s704_s7 = smov [#allocation6]  }
  0x40   : > { %p601_p2 = scmp.ne.s32.totalorder %s849_s19, %s600_s3  ;;  %s605_s8 = sshll.u32 %s704_s7, 4  ;;  %s606_s8 = int_to_ptr.vmem [resolvable:$false] %s605_s8 }
  0x41   : > { %s607_s15 = scalar_lea.vmem %s606_s8, 2048  ;;  %p608_p8 = scmp.lt.s32.totalorder %s849_s19, %s606_s8 }
  0x42   : > { %p603_p9 = pnand %p601_p2, %p557_p5  ;;  %p609_p3 = scmp.lt.s32.totalorder %s607_s15, %s600_s3 }
  0x44   : > { %p604_p11 = pneg %p603_p9  ;;  %p610_p6 = por %p609_p3, %p608_p8 }
  0x46   : > { %p611_p4 = pnand %p610_p6, %p604_p11 }
  0x48   : > { %614 = shalt.err (!%p611_p4)
}
  0x49   : > { %s705_s18 = smov 128   ;;  %s706_s4 = smov 8  }
  0x4a   : > { %497 = dma.hbm_to_vmem [thread:$0]  (!%p802_p0), %s847_s16, 1024, %s849_s19, %s164_s30, %s705_s18, %s705_s18, %s706_s4  }
  0x4b   : > { %189 = sbr.rel (%p838_p7) target bundleno = 136 (0x88), region = 28  ;;  %s880_s6 = sand.u32 (!%p838_p7), 1, %s685_s10  }
  0x4c   : > { %s477_s20 = sshll.u32 (!%p838_p7), %s880_s6, 3  ;;  %s192_s26 = scalar_lea.sflag (!%p838_p7), [#allocation4], %s880_s6 }
  0x4d   : > { %s195_s27 = scalar_lea.vmem (!%p838_p7), [#allocation3], %s477_s20  ;;  %p977_p8 = scmp.ne.s32.totalorder (!%p838_p7), %s970_s21, 0 }
  0x52   : > { %668 = dma.done.wait (%p977_p8), %s192_s26, 128  }
  0x53   : > { %670 = vsyncadd (%p977_p8), %s192_s26, 4294967168  ;;  %s478_s25 = sshll.u32 %s880_s6, 6  ;;  %s201_s5 = scalar_lea.sflag [#allocation7], %s880_s6 }
  0x54   : > { %s204_s29 = scalar_lea.vmem [#allocation6], %s478_s25 }
  0x55   : > { %672 = dma.done.wait (%p977_p8), %s201_s5, 1024  }
  0x56   : > { %674 = vsyncadd (%p977_p8), %s201_s5, 4294966272  ;;  %vm235_vm0 = vcmask 261120   ;;  %v707_v0 = vmov 0.0   ;;  %v238_v1 = vld [vmem:[%s204_s29] sm:$0xff]  ;;  %v239_v2 = vld [vmem:[%s204_s29 + $0x8] sm:$0xff]  ;;  %vm320_vm1 = vcmask 1041409  }
  0x57   : > { %236 = vst.msk [vmem:[#allocation2] sm:$0xff] %vm235_vm0, %v707_v0  ;;  %v240_v3 = vld [vmem:[%s204_s29 + $0x10] sm:$0xff]  ;;  %v241_v4 = vld [vmem:[%s204_s29 + $0x18] sm:$0xff]  ;;  %v242_v5 = vld [vmem:[%s204_s29 + $0x20] sm:$0xff]  ;;  %vm322_vm2 = vcmask 1042434   ;;  %vm324_vm3 = vcmask 1043459  }
  0x58   : > { %v243_v6 = vld [vmem:[%s204_s29 + $0x28] sm:$0xff]  ;;  %v244_v7 = vld [vmem:[%s204_s29 + $0x30] sm:$0xff]  ;;  %v245_v8 = vld [vmem:[%s204_s29 + $0x38] sm:$0xff]  ;;  %vm326_vm4 = vcmask 1044484   ;;  %vm328_vm5 = vcmask 1045509   ;;  %vm330_vm6 = vcmask 1046534  }
  0x59   : > { %v246_v9 = vld [vmem:[%s195_s27] sm:$0xff]  ;;  %vm332_vm7 = vcmask 1047559   ;;  %s229_s21 = scalar_lea.vmem [#allocation8], %s477_s20  ;;  %s481_s19 = sshll.u32 %s693_s12, 7 }
  0x5a   : > { %v247_v10 = vmul.f32 %v246_v9, %v238_v1  ;;  %v248_v11 = vmul.f32 %v246_v9, %v239_v2  ;;  %v249_v12 = vmul.f32 %v246_v9, %v240_v3  ;;  %v250_v13 = vmul.f32 %v246_v9, %v241_v4  ;;  %s357_s16 = sshll.u32 %s229_s21, 4  ;;  %s916_s3 = scalar_lea.hbm %s966_s2, %s481_s19  ;;  %s911_s16 = int_to_ptr.vmem [resolvable:$true] %s357_s16 }
  0x5b   : > { %v251_v14 = vmul.f32 %v246_v9, %v242_v5  ;;  %v252_v15 = vmul.f32 %v246_v9, %v243_v6  ;;  %v253_v16 = vmul.f32 %v246_v9, %v244_v7  ;;  %v254_v17 = vmul.f32 %v246_v9, %v245_v8  ;;  %s343_s7 = scalar_lea.sflag [#allocation5], %s880_s6  ;;  %s615_s8 = scalar_lea.vmem %s911_s16, 128 }
  0x5c   : > { %v256_v18 = vsel %vm235_vm0, %v247_v10, 0.0  ;;  %v263_v19 = vsel %vm235_vm0, %v248_v11, 0.0  ;;  %v270_v20 = vsel %vm235_vm0, %v249_v12, 0.0  ;;  %v277_v21 = vsel %vm235_vm0, %v250_v13, 0.0  ;;  %p616_p0 = scmp.ne.s32.totalorder %s911_s16, %s615_s8  ;;  %p978_p5 = scmp.ne.s32.totalorder %s971_s22, 0 }
  0x5d   : > { %v257_v22 = vrot.slane %v256_v18, 4  ;;  %v264_v23 = vrot.slane %v263_v19, 4  ;;  %v271_v24 = vrot.slane %v270_v20, 4  ;;  %v278_v25 = vrot.slane %v277_v21, 4  ;;  %s708_s12 = smov [#allocation8]  }
  0x5e   : > { %v284_v26 = vsel %vm235_vm0, %v251_v14, 0.0  ;;  %v291_v27 = vsel %vm235_vm0, %v252_v15, 0.0  ;;  %v298_v28 = vsel %vm235_vm0, %v253_v16, 0.0  ;;  %v305_v29 = vsel %vm235_vm0, %v254_v17, 0.0  ;;  %v237_v14 = vld [vmem:[#allocation2] sm:$0xff]  ;;  %p617_p7 = pnand %p616_p0, %p978_p5  ;;  %s619_s15 = sshll.u32 %s708_s12, 4  ;;  %s620_s15 = int_to_ptr.vmem [resolvable:$false] %s619_s15 }
  0x5f   : > { %v258_v30 = vadd.f32 %v257_v22, %v256_v18  ;;  %v265_v31 = vadd.f32 %v264_v23, %v263_v19  ;;  %v272_v32 = vadd.f32 %v271_v24, %v270_v20  ;;  %v279_v33 = vadd.f32 %v278_v25, %v277_v21  ;;  %s621_s18 = scalar_lea.vmem %s620_s15, 256  ;;  %p622_p10 = scmp.lt.s32.totalorder %s911_s16, %s620_s15 }
  0x60   : > { %v285_v34 = vrot.slane %v284_v26, 4  ;;  %v292_v35 = vrot.slane %v291_v27, 4  ;;  %v299_v36 = vrot.slane %v298_v28, 4  ;;  %v306_v37 = vrot.slane %v305_v29, 4  ;;  %p618_p13 = pneg %p617_p7  ;;  %p623_p12 = scmp.lt.s32.totalorder %s621_s18, %s615_s8 }
  0x61   : > { %v259_v38 = vrot.slane %v258_v30, 2  ;;  %v266_v39 = vrot.slane %v265_v31, 2  ;;  %v273_v40 = vrot.slane %v272_v32, 2  ;;  %v280_v41 = vrot.slane %v279_v33, 2 }
  0x62   : > { %v286_v42 = vadd.f32 %v285_v34, %v284_v26  ;;  %v293_v43 = vadd.f32 %v292_v35, %v291_v27  ;;  %v300_v44 = vadd.f32 %v299_v36, %v298_v28  ;;  %v307_v45 = vadd.f32 %v306_v37, %v305_v29  ;;  %p624_p1 = por %p623_p12, %p622_p10 }
  0x63   : > { %v260_v46 = vadd.f32 %v259_v38, %v258_v30  ;;  %v267_v47 = vadd.f32 %v266_v39, %v265_v31  ;;  %v274_v48 = vadd.f32 %v273_v40, %v272_v32  ;;  %v281_v49 = vadd.f32 %v280_v41, %v279_v33 }
  0x64   : > { %v287_v50 = vrot.slane %v286_v42, 2  ;;  %v294_v51 = vrot.slane %v293_v43, 2  ;;  %v301_v52 = vrot.slane %v300_v44, 2  ;;  %v308_v53 = vrot.slane %v307_v45, 2  ;;  %p625_p2 = pnand %p624_p1, %p618_p13 }
  0x65   : > { %v261_v54 = vrot.slane %v260_v46, 1  ;;  %v268_v55 = vrot.slane %v267_v47, 1  ;;  %v275_v56 = vrot.slane %v274_v48, 1  ;;  %v282_v57 = vrot.slane %v281_v49, 1 }
  0x66   : > { %v288_v58 = vadd.f32 %v287_v50, %v286_v42  ;;  %v295_v59 = vadd.f32 %v294_v51, %v293_v43  ;;  %v302_v60 = vadd.f32 %v301_v52, %v300_v44  ;;  %v309_v61 = vadd.f32 %v308_v53, %v307_v45 }
  0x67   : > { %v262_v62 = vadd.f32 %v261_v54, %v260_v46  ;;  %v269_v63 = vadd.f32 %v268_v55, %v267_v47  ;;  %v276_v0 = vadd.f32 %v275_v56, %v274_v48  ;;  %v283_v1 = vadd.f32 %v282_v57, %v281_v49 }
  0x68   : > { %v289_v2 = vrot.slane %v288_v58, 1  ;;  %v296_v3 = vrot.slane %v295_v59, 1  ;;  %v303_v4 = vrot.slane %v302_v60, 1  ;;  %v310_v5 = vrot.slane %v309_v61, 1 }
  0x69   : > { %v321_v6 = vsel %vm320_vm1, %v269_v63, %v262_v62 }
  0x6a   : > { %v290_v7 = vadd.f32 %v289_v2, %v288_v58  ;;  %v297_v8 = vadd.f32 %v296_v3, %v295_v59  ;;  %v304_v9 = vadd.f32 %v303_v4, %v302_v60  ;;  %v323_v10 = vsel %vm322_vm2, %v276_v0, %v321_v6 }
  0x6b   : > { %v311_v11 = vadd.f32 %v310_v5, %v309_v61  ;;  %v325_v12 = vsel %vm324_vm3, %v283_v1, %v323_v10 }
  0x6c   : > { %v327_v13 = vsel %vm326_vm4, %v290_v7, %v325_v12 }
  0x6d   : > { %v329_v15 = vsel %vm328_vm5, %v297_v8, %v327_v13 }
  0x6e   : > { %v331_v16 = vsel %vm330_vm6, %v304_v9, %v329_v15 }
  0x6f   : > { %v333_v17 = vsel %vm332_vm7, %v311_v11, %v331_v16 }
  0x70   : > { %v335_v18 = vadd.f32 %v333_v17, %v237_v14 }
  0x72   : > { %336 = vst.msk [vmem:[#allocation2] sm:$0xff] %vm235_vm0, %v335_v18 }
  0x79   : > { %v340_v19 = vld [vmem:[#allocation2] sm:$0xff] }
  0x7a   : > { %341 = vst.msk [vmem:[%s229_s21] sm:$0xff] %vm235_vm0, %v340_v19 }
  0x7b   : > { %628 = shalt.err (!%p625_p2)
}
  0x7c   : > { %s629_s4 = scalar_lea.hbm %s916_s3, 128  ;;  %s633_s26 = scalar_lea.hbm %s966_s2, 256 }
  0x7d   : > { %p630_p9 = scmp.ne.s32.totalorder %s916_s3, %s629_s4  ;;  %p634_p6 = scmp.lt.u32.totalorder %s916_s3, %s966_s2 }
  0x7e   : > { %p635_p4 = scmp.lt.u32.totalorder %s633_s26, %s629_s4  ;;  %p637_p0 = scmp.lt.u32.totalorder %s629_s4, %s916_s3 }
  0x7f   : > { %p631_p11 = pnand %p630_p9, %p978_p5 }
  0x80   : > { %p636_p8 = por %p635_p4, %p634_p6 }
  0x81   : > { %p632_p3 = pneg %p631_p11 }
  0x82   : > { %p638_p7 = por %p637_p0, %p636_p8 }
  0x84   : > { %p639_p13 = pnand %p638_p7, %p632_p3 }
  0x86   : > { %642 = shalt.err (!%p639_p13)
}
  0x87   : > { %489 = dma.vmem_to_hbm [thread:$0]  (%p978_p5), %s911_s16, 128, %s916_s3, %s343_s7  }
  0x88 PF: > { %s369_s5 = sand.u32 1, %s681_s9   ;;  %p979_p10 = scmp.ne.s32.totalorder %s972_s24, 0 }
  0x89   : > { %p980_p12 = scmp.ge.s32.totalorder %s701_s14, 2  ;;  %s370_s29 = scalar_lea.sflag [#allocation5], %s369_s5 }
  0x8b   : > { %p499_p1 = pnand %p980_p12, %p979_p10 }
  0x8d   : > { %676 = dma.done.wait (!%p499_p1), %s370_s29, 128  }
  0x8e   : > { %678 = vsyncadd (!%p499_p1), %s370_s29, 4294967168  ;;  %s21_s14 = sadd.s32 1, %s701_s14   ;;  %s981_s9 = smov %s685_s10 }
  0x8f   : > { %p18_p2 = scmp.ge.s32.totalorder %s21_s14, 4   ;;  %s982_s10 = smov %s689_s11 }
  0x90   : > { %s983_s11 = smov %s780_s23  ;;  %s984_s12 = smov %s697_s13 }
  0x91   : > { %s985_s13 = smov %s987_s17  ;;  %20 = sbr.rel (!%p18_p2) target bundleno = 8 (0x8), region = 94 }
  0x98   :  { %375 = vsyncpa [#allocation4], 1 }
  0x99   :  { %377 = vsyncpa [#allocation4 + $0x1], 1 }
  0x9a   :  { %378 = vsyncpa [#allocation7], 1 }
  0x9b   :  { %380 = vsyncpa [#allocation7 + $0x1], 1 }
  0x9c   :  { %381 = vsyncpa [#allocation5], 1 }
  0x9d   :  { %383 = vsyncpa [#allocation5 + $0x1], 1 }

</bundles_post_ra>
